<compile_context>
chip_gen: v7x
topology: tpu7x:2x2x1
jax: 0.10.0
libtpu: 0.0.40
codegen_flags: <defaults>
</compile_context>

<pallas_src>
import functools

import jax
import jax.numpy as jnp
from jax import lax
from jax.experimental import pallas as pl
from jax.experimental.pallas import tpu as pltpu

F32 = jnp.float32
BF16 = jnp.bfloat16


# ------------------------- generation-dependent tuning ----------------------

@functools.lru_cache(maxsize=1)
def _tpu_budget():
    """Tile targets + scoped-VMEM limit per TPU generation."""
    vmem_cap = None
    try:
        info = pltpu.get_tpu_info()
        vmem_cap = getattr(info, "vmem_capacity_bytes", None)
    except Exception:
        vmem_cap = None
    if vmem_cap is not None and vmem_cap >= 100 * 1024 * 1024:
        # v5e / v6e: 128 MiB physical VMEM -> bigger tiles, fewer weight
        # re-reads across the M grid (biggest win on v5e's low HBM BW).
        return dict(vmem_limit=96 * 1024 * 1024, tm=512, tn=512, tk=1024)
    # v7x (64 MiB physical) or unknown: conservative.
    return dict(vmem_limit=48 * 1024 * 1024, tm=256, tn=256, tk=512)


def _cparams(semantics):
    return pltpu.CompilerParams(dimension_semantics=semantics,
                                vmem_limit_bytes=_tpu_budget()["vmem_limit"])


def _pick_tile(size, target, align):
    """Largest tile <= target that is a multiple of `align` and divides `size`;
    falls back to the full dimension (always legal: block == array extent)."""
    if size <= target:
        return size
    t = (target // align) * align
    while t >= align:
        if size % t == 0:
            return t
        t -= align
    return size


def _gelu(y):
    # exact (erf) GELU in f32, matching torch.nn.GELU default
    return 0.5 * y * (1.0 + lax.erf(y * jnp.float32(0.7071067811865476)))


# ----------------------------- Pallas kernels -------------------------------

def _ln_linear_kernel(x_ref, g_ref, b_ref, w_ref, bias_ref, o_ref, xn_ref, *,
                      eps, activation):
    """Fused LayerNorm (f32, cached per row block) -> bf16 matmul -> bias(+GELU).

    Grid is (M//tm, N//tn) with j trailing/'arbitrary'; the normalized bf16
    row block is computed once (j==0) into VMEM scratch and reused for all
    N-tiles of that row block.
    """
    j = pl.program_id(1)

    @pl.when(j == 0)
    def _():
        x = x_ref[...].astype(jnp.float32)
        mu = jnp.mean(x, axis=-1, keepdims=True)
        xc = x - mu
        var = jnp.mean(xc * xc, axis=-1, keepdims=True)
        xn = xc * lax.rsqrt(var + eps) * g_ref[...] + b_ref[...]
        xn_ref[...] = xn.astype(jnp.bfloat16)

    y = jnp.dot(xn_ref[...], w_ref[...], preferred_element_type=jnp.float32)
    y = y + bias_ref[...]
    if activation == "gelu":
        y = _gelu(y)
    o_ref[...] = y.astype(o_ref.dtype)


def pallas_ln_linear(x, g, b, w, bias, activation=None, out_dtype=BF16,
                     eps=1e-6):
    M, K = x.shape
    N = w.shape[1]
    bud = _tpu_budget()
    tm = _pick_tile(M, bud["tm"], 8)
    tn = _pick_tile(N, bud["tn"], 128)
    grid = (M // tm, N // tn)
    # NOTE: LN needs the full-K row, so K is not tiled here (K == model dim,
    # which fits comfortably in VMEM even at ViT-g sizes).
    return pl.pallas_call(
        functools.partial(_ln_linear_kernel, eps=eps, activation=activation),
        grid=grid,
        in_specs=[
            pl.BlockSpec((tm, K), lambda i, j: (i, 0)),
            pl.BlockSpec((1, K), lambda i, j: (0, 0)),
            pl.BlockSpec((1, K), lambda i, j: (0, 0)),
            pl.BlockSpec((K, tn), lambda i, j: (0, j)),
            pl.BlockSpec((1, tn), lambda i, j: (0, j)),
        ],
        out_specs=pl.BlockSpec((tm, tn), lambda i, j: (i, j)),
        out_shape=jax.ShapeDtypeStruct((M, N), out_dtype),
        scratch_shapes=[pltpu.VMEM((tm, K), jnp.bfloat16)],
        compiler_params=_cparams(("parallel", "arbitrary")),
    )(x, g, b, w, bias)


def _linear_kernel(x_ref, w_ref, bias_ref, o_ref):
    """Tiled matmul with bias epilogue; accumulates directly into the resident
    f32 output block (its block index is constant across the k axis)."""
    k = pl.program_id(2)

    @pl.when(k == 0)
    def _():
        o_ref[...] = jnp.zeros_like(o_ref)

    o_ref[...] += jnp.dot(x_ref[...], w_ref[...],
                          preferred_element_type=jnp.float32)

    @pl.when(k == pl.num_programs(2) - 1)
    def _():
        o_ref[...] = o_ref[...] + bias_ref[...]


def pallas_linear(x, w, bias):
    M, K = x.shape
    N = w.shape[1]
    bud = _tpu_budget()
    tm = _pick_tile(M, bud["tm"], 8)
    tn = _pick_tile(N, bud["tn"], 128)
    tk = _pick_tile(K, bud["tk"], 128)
    grid = (M // tm, N // tn, K // tk)
    return pl.pallas_call(
        _linear_kernel,
        grid=grid,
        in_specs=[
            pl.BlockSpec((tm, tk), lambda i, j, k: (i, k)),
            pl.BlockSpec((tk, tn), lambda i, j, k: (k, j)),
            pl.BlockSpec((1, tn), lambda i, j, k: (0, j)),
        ],
        out_specs=pl.BlockSpec((tm, tn), lambda i, j, k: (i, j)),
        out_shape=jax.ShapeDtypeStruct((M, N), F32),
        compiler_params=_cparams(("parallel", "parallel", "arbitrary")),
    )(x.astype(BF16), w, bias)


def _linear_scale_res_kernel(x_ref, w_ref, bias_ref, g_ref, r_ref, o_ref):
    """Tiled matmul with fused epilogue: out = residual + LayerScale * (xW+b).
    Accumulates directly into the resident f32 output block."""
    k = pl.program_id(2)

    @pl.when(k == 0)
    def _():
        o_ref[...] = jnp.zeros_like(o_ref)

    o_ref[...] += jnp.dot(x_ref[...], w_ref[...],
                          preferred_element_type=jnp.float32)

    @pl.when(k == pl.num_programs(2) - 1)
    def _():
        o_ref[...] = r_ref[...] + (o_ref[...] + bias_ref[...]) * g_ref[...]


def pallas_linear_scale_residual(x, w, bias, gamma, residual):
    M, K = x.shape
    N = w.shape[1]
    bud = _tpu_budget()
    tm = _pick_tile(M, bud["tm"], 8)
    tn = _pick_tile(N, bud["tn"], 128)
    tk = _pick_tile(K, bud["tk"], 128)
    grid = (M // tm, N // tn, K // tk)
    return pl.pallas_call(
        _linear_scale_res_kernel,
        grid=grid,
        in_specs=[
            pl.BlockSpec((tm, tk), lambda i, j, k: (i, k)),
            pl.BlockSpec((tk, tn), lambda i, j, k: (k, j)),
            pl.BlockSpec((1, tn), lambda i, j, k: (0, j)),
            pl.BlockSpec((1, tn), lambda i, j, k: (0, j)),
            pl.BlockSpec((tm, tn), lambda i, j, k: (i, j)),
        ],
        out_specs=pl.BlockSpec((tm, tn), lambda i, j, k: (i, j)),
        out_shape=jax.ShapeDtypeStruct((M, N), F32),
        compiler_params=_cparams(("parallel", "parallel", "arbitrary")),
    )(x, w, bias, gamma, residual)


def _attn_kernel(q_ref, k_ref, v_ref, o_ref, *, heads, dim, n_real):
    """Query-tiled attention: one (tq, dim) q tile x resident (N, dim) k/v
    slabs per grid step; per-head results stored directly into the output
    slice. 1/sqrt(d) is pre-folded into the q weights."""
    n_keys = k_ref.shape[1]
    d = dim // heads
    q = q_ref[0]                                           # (tq, dim)  bf16
    kk = k_ref[0]                                          # (N,  dim)  bf16
    vv = v_ref[0]                                          # (N,  dim)  bf16

    kbias = None
    if n_real < n_keys:                                    # mask padded keys
        kbias = jnp.where(
            lax.broadcasted_iota(jnp.int32, (1, n_keys), 1) < n_real,
            jnp.float32(0.0), jnp.float32(-1e30))

    # TODO(synk): for head_dim=64 configs, process 2 heads per iteration (or
    # pre-permute qkv_w) so every slice starts on a 128-lane boundary.
    for h in range(heads):
        qh = q[:, h * d:(h + 1) * d]
        kh = kk[:, h * d:(h + 1) * d]
        vh = vv[:, h * d:(h + 1) * d]
        s = lax.dot_general(qh, kh, (((1,), (1,)), ((), ())),
                            preferred_element_type=jnp.float32)
        if kbias is not None:
            s = s + kbias
        m = jnp.max(s, axis=-1, keepdims=True)
        p = jnp.exp(s - m)
        denom = jnp.sum(p, axis=-1, keepdims=True)
        pv = jnp.dot(p.astype(jnp.bfloat16), vh,
                     preferred_element_type=jnp.float32)
        # EUP reciprocal, applied after the PV matmul (tq*d mults, not tq*N)
        o_ref[0, :, h * d:(h + 1) * d] = (
            pv * pl.reciprocal(denom, approx=True)).astype(o_ref.dtype)


def pallas_attention(qkv, *, heads, dim, n_real):
    B, N, _ = qkv.shape
    bud = _tpu_budget()
    tq = _pick_tile(N, bud["tm"], 128)
    grid = (B, N // tq)
    # Three BlockSpec views into the same qkv tensor: q is query-tiled, k/v
    # are the full (N, dim) column slabs (resident across the q-tile axis).
    return pl.pallas_call(
        functools.partial(_attn_kernel, heads=heads, dim=dim, n_real=n_real),
        grid=grid,
        in_specs=[
            pl.BlockSpec((1, tq, dim), lambda b, qi: (b, qi, 0)),
            pl.BlockSpec((1, N, dim), lambda b, qi: (b, 0, 1)),
            pl.BlockSpec((1, N, dim), lambda b, qi: (b, 0, 2)),
        ],
        out_specs=pl.BlockSpec((1, tq, dim), lambda b, qi: (b, qi, 0)),
        out_shape=jax.ShapeDtypeStruct((B, N, dim), BF16),
        compiler_params=_cparams(("parallel", "parallel")),
    )(qkv, qkv, qkv)


# --------------------------- parameter creation ------------------------------

def init_params(key, *, in_chans, patch, dim, depth, heads, mlp_ratio,
                num_tokens):
    hidden = dim * mlp_ratio
    keys = iter(jax.random.split(key, 8 + depth * 12))

    def nrm(shape, std=0.02):
        return jax.random.normal(next(keys), shape, F32) * std

    # patch-embed conv(k=p, s=p) flattened; K padded to a lane multiple of 128
    P = in_chans * patch * patch
    P_pad = -(-P // 128) * 128
    pw = nrm((P, dim))
    pw = jnp.pad(pw, ((0, P_pad - P), (0, 0)))

    d = dim // heads
    scale = jnp.float32(d ** -0.5)

    params = dict(
        patch_w=pw.astype(BF16),
        patch_b=nrm((1, dim)),
        cls_token=nrm((1, 1, dim)),
        pos_embed=nrm((1, num_tokens, dim)),
        patch_k=P, patch_k_pad=P_pad,
        blocks=[],
    )
    for _ in range(depth):
        qkv_w = nrm((dim, 3 * dim))
        qkv_b = nrm((1, 3 * dim))
        # fold the 1/sqrt(d) attention scale into the q columns (weight prep)
        qkv_w = qkv_w.at[:, :dim].multiply(scale)
        qkv_b = qkv_b.at[:, :dim].multiply(scale)
        params["blocks"].append(dict(
            n1_g=jnp.ones((1, dim), F32), n1_b=jnp.zeros((1, dim), F32),
            qkv_w=qkv_w.astype(BF16), qkv_b=qkv_b,
            proj_w=nrm((dim, dim)).astype(BF16), proj_b=nrm((1, dim)),
            ls1=jnp.full((1, dim), 0.1, F32),
            n2_g=jnp.ones((1, dim), F32), n2_b=jnp.zeros((1, dim), F32),
            fc1_w=nrm((dim, hidden)).astype(BF16), fc1_b=nrm((1, hidden)),
            fc2_w=nrm((hidden, dim)).astype(BF16), fc2_b=nrm((1, dim)),
            ls2=jnp.full((1, dim), 0.1, F32),
        ))
    # TODO(synk): v7x-only fp8 weight quantization (per-N-tile scales applied
    # in the existing bias/LayerScale epilogues) not implemented.
    return params


# ------------------------------ forward pass ---------------------------------

def center_padding(images, patch_size):
    # exact reproduction of the torch helper (incl. its "pad a full patch if
    # only one of h/w is already divisible" behaviour)
    _, _, h, w = images.shape
    diff_h = h % patch_size
    diff_w = w % patch_size
    if diff_h == 0 and diff_w == 0:
        return images
    pad_h = patch_size - diff_h
    pad_w = patch_size - diff_w
    pad_t = pad_h // 2
    pad_l = pad_w // 2
    pad_r = pad_w - pad_l
    pad_b = pad_h - pad_t
    return jnp.pad(images, ((0, 0), (0, 0), (pad_t, pad_b), (pad_l, pad_r)))


def block_forward(x2d, p, B, N, dim, heads, n_real):
    M = B * N
    # attention branch: LN fused into the qkv matmul (bf16 out, scale folded)
    qkv = pallas_ln_linear(x2d, p["n1_g"], p["n1_b"], p["qkv_w"], p["qkv_b"],
                           out_dtype=BF16)
    qkv = qkv.reshape(B, N, 3 * dim)              # free reshape, no transpose
    o = pallas_attention(qkv, heads=heads, dim=dim, n_real=n_real)
    o2d = o.reshape(M, dim)
    # proj matmul fused with LayerScale*y + residual epilogue
    x2d = pallas_linear_scale_residual(o2d, p["proj_w"], p["proj_b"],
                                       p["ls1"], x2d)
    # MLP branch: LN fused into fc1 (+GELU); fc2 fused with LayerScale+residual
    h = pallas_ln_linear(x2d, p["n2_g"], p["n2_b"], p["fc1_w"], p["fc1_b"],
                         activation="gelu", out_dtype=BF16)
    x2d = pallas_linear_scale_residual(h, p["fc2_w"], p["fc2_b"],
                                       p["ls2"], x2d)
    return x2d


def dino_forward(params, images, cfg):
    patch, dim, heads = cfg["patch"], cfg["dim"], cfg["heads"]
    images = center_padding(images, patch)
    B, C, H, W = images.shape
    h, w = H // patch, W // patch

    # ---- prepare_tokens_with_masks ----
    # patch embed: conv(kernel=patch, stride=patch)  ==  unfold + tiled matmul
    xp = images.reshape(B, C, h, patch, w, patch)
    xp = xp.transpose(0, 2, 4, 1, 3, 5).reshape(B * h * w, C * patch * patch)
    k_pad = params["patch_k_pad"]
    if k_pad != params["patch_k"]:
        xp = jnp.pad(xp, ((0, 0), (0, k_pad - params["patch_k"])))
    tok = pallas_linear(xp, params["patch_w"], params["patch_b"])  # f32
    tok = tok.reshape(B, h * w, dim)
    cls = jnp.broadcast_to(params["cls_token"], (B, 1, dim))
    x = jnp.concatenate([cls, tok], axis=1)
    # TODO(synk): DINOv2 bicubic pos-embed interpolation omitted; pos_embed is
    # sized to the token grid so the interpolation is the identity here.
    x = x + params["pos_embed"]

    # pad token count to a lane multiple of 128 so every matmul M-dim tile and
    # the attention key axis stay lane-dense; padded keys are masked inside
    # the attention kernel so they never influence real tokens.
    n_real = x.shape[1]
    n_pad = -(-n_real // 128) * 128
    if n_pad != n_real:
        x = jnp.pad(x, ((0, 0), (0, n_pad - n_real), (0, 0)))
    N = n_pad
    x2d = x.reshape(B * N, dim)

    # ---- transformer blocks, multilayer collection ----
    embeds = []
    for i, bp in enumerate(params["blocks"]):
        x2d = block_forward(x2d, bp, B, N, dim, heads, n_real)
        if i in cfg["multilayers"]:
            embeds.append(x2d.reshape(B, N, dim))
            if len(embeds) == len(cfg["multilayers"]):
                break

    # ---- tokens_to_output('dense-cls') ----
    num_spatial = h * w
    outputs = []
    for x_i in embeds:
        cls_tok = x_i[:, 0]                                   # [B, dim]
        # pad tokens sit at the end, so spatial tokens are [1 : 1+hw]
        # (== x_i[:, -hw:] of the unpadded torch reference)
        spatial = x_i[:, 1:1 + num_spatial]                   # [B, hw, dim]
        dense = spatial.transpose(0, 2, 1).reshape(B, dim, h, w)
        cls_map = jnp.broadcast_to(cls_tok[:, :, None, None], (B, dim, h, w))
        outputs.append(jnp.concatenate([dense, cls_map], axis=1))
    return outputs[0] if len(outputs) == 1 else outputs


# ---------------------------------- main -------------------------------------

if __name__ == "__main__":
    key = jax.random.PRNGKey(0)
    k_img, k_par = jax.random.split(key)

    # small synthetic DINOv2-style config (dims kept 128-aligned so the
    # per-head slices and all matmul tiles stay lane-aligned)
    B, C, H, W = 2, 3, 16, 16
    patch, dim, depth, heads, mlp_ratio = 4, 256, 4, 2, 4
    num_tokens = 1 + (H // patch) * (W // patch)

    images = jax.random.normal(k_img, (B, C, H, W), F32)
    params = init_params(k_par, in_chans=C, patch=patch, dim=dim, depth=depth,
                         heads=heads, mlp_ratio=mlp_ratio,
                         num_tokens=num_tokens)

    multilayers = [depth // 4 - 1, depth // 2 - 1, depth // 4 * 3 - 1,
                   depth - 1]
    cfg = dict(patch=patch, dim=dim, heads=heads, multilayers=multilayers)

    outs = dino_forward(params, images, cfg)
    outs = jax.block_until_ready(outs)

    assert isinstance(outs, list) and len(outs) == len(multilayers)
    for o in outs:
        assert o.shape == (B, 2 * dim, H // patch, W // patch), o.shape
        assert o.dtype == F32
    print("KERNEL_OK")
</pallas_src>

<mosaic_0001>
module attributes {stable_mosaic.version = 11 : i64} {
  func.func @_linear_kernel(%arg0: i32, %arg1: i32, %arg2: i32, %arg3: memref<32x128xbf16, #tpu.memory_space<vmem>>, %arg4: memref<128x256xbf16, #tpu.memory_space<vmem>>, %arg5: memref<1x256xf32, #tpu.memory_space<vmem>>, %arg6: memref<32x256xf32, #tpu.memory_space<vmem>>) attributes {dimension_semantics = [#tpu.dimension_semantics<parallel>, #tpu.dimension_semantics<parallel>, #tpu.dimension_semantics<arbitrary>], iteration_bounds = array<i64: 1, 1, 1>, scalar_prefetch = 0 : i64, scratch_operands = 0 : i64, tpu.core_type = #tpu.core_type<tc>, window_params = [{transform_indices = @transform_0, window_bounds = array<i64: 32, 128>}, {transform_indices = @transform_1, window_bounds = array<i64: 128, 256>}, {transform_indices = @transform_2, window_bounds = array<i64: 1, 256>}, {transform_indices = @transform_3, window_bounds = array<i64: 32, 256>}]} {
    %c0_i32 = arith.constant 0 : i32
    %0 = arith.cmpi eq, %arg2, %c0_i32 : i32
    %1 = arith.extui %0 : i1 to i32
    %c0_i32_0 = arith.constant 0 : i32
    %2 = arith.cmpi ne, %1, %c0_i32_0 : i32
    scf.if %2 {
      %cst_10 = arith.constant 0.000000e+00 : f32
      %12 = vector.broadcast %cst_10 : f32 to vector<32x256xf32>
      %c0_11 = arith.constant 0 : index
      %c0_12 = arith.constant 0 : index
      %13 = vector.load %arg6[%c0_11, %c0_12] : memref<32x256xf32, #tpu.memory_space<vmem>>, vector<32x256xf32>
      tpu.vector_store %arg6[%c0_11, %c0_12], %12 {strides = array<i32>} : memref<32x256xf32, #tpu.memory_space<vmem>>, vector<32x256xf32>,
    } else {
    }
    %c0 = arith.constant 0 : index
    %c0_1 = arith.constant 0 : index
    %3 = vector.load %arg6[%c0, %c0_1] : memref<32x256xf32, #tpu.memory_space<vmem>>, vector<32x256xf32>
    %c0_2 = arith.constant 0 : index
    %c0_3 = arith.constant 0 : index
    %4 = vector.load %arg3[%c0_2, %c0_3] : memref<32x128xbf16, #tpu.memory_space<vmem>>, vector<32x128xbf16>
    %c0_4 = arith.constant 0 : index
    %c0_5 = arith.constant 0 : index
    %5 = vector.load %arg4[%c0_4, %c0_5] : memref<128x256xbf16, #tpu.memory_space<vmem>>, vector<128x256xbf16>
    %cst = arith.constant dense<0.000000e+00> : vector<32x256xf32>
    %6 = tpu.matmul %4, %5, %cst {dimension_numbers = #tpu.dot_dimension_numbers<[1], [0], [0], [1], [0, 0, 1, 1], [], []>} : vector<32x128xbf16>, vector<128x256xbf16>, vector<32x256xf32> -> vector<32x256xf32>
    %7 = arith.addf %3, %6 : vector<32x256xf32>
    %c0_6 = arith.constant 0 : index
    %c0_7 = arith.constant 0 : index
    %8 = vector.load %arg6[%c0_6, %c0_7] : memref<32x256xf32, #tpu.memory_space<vmem>>, vector<32x256xf32>
    tpu.vector_store %arg6[%c0_6, %c0_7], %7 {strides = array<i32>} : memref<32x256xf32, #tpu.memory_space<vmem>>, vector<32x256xf32>,
    %c0_i32_8 = arith.constant 0 : i32
    %9 = arith.cmpi eq, %arg2, %c0_i32_8 : i32
    %10 = arith.extui %9 : i1 to i32
    %c0_i32_9 = arith.constant 0 : i32
    %11 = arith.cmpi ne, %10, %c0_i32_9 : i32
    scf.if %11 {
      %c0_10 = arith.constant 0 : index
      %c0_11 = arith.constant 0 : index
      %12 = vector.load %arg6[%c0_10, %c0_11] : memref<32x256xf32, #tpu.memory_space<vmem>>, vector<32x256xf32>
      %c0_12 = arith.constant 0 : index
      %c0_13 = arith.constant 0 : index
      %13 = vector.load %arg5[%c0_12, %c0_13] : memref<1x256xf32, #tpu.memory_space<vmem>>, vector<1x256xf32>
      %14 = vector.broadcast %13 : vector<1x256xf32> to vector<32x256xf32>
      %15 = arith.addf %12, %14 : vector<32x256xf32>
      %c0_14 = arith.constant 0 : index
      %c0_15 = arith.constant 0 : index
      %16 = vector.load %arg6[%c0_14, %c0_15] : memref<32x256xf32, #tpu.memory_space<vmem>>, vector<32x256xf32>
      tpu.vector_store %arg6[%c0_14, %c0_15], %15 {strides = array<i32>} : memref<32x256xf32, #tpu.memory_space<vmem>>, vector<32x256xf32>,
    } else {
    }
    return
  }
  func.func @transform_0(%arg0: i32, %arg1: i32, %arg2: i32) -> (i32, i32) {
    %c0_i32 = arith.constant 0 : i32
    return %arg0, %arg2 : i32, i32
  }
  func.func @transform_1(%arg0: i32, %arg1: i32, %arg2: i32) -> (i32, i32) {
    %c0_i32 = arith.constant 0 : i32
    return %arg2, %arg1 : i32, i32
  }
  func.func @transform_2(%arg0: i32, %arg1: i32, %arg2: i32) -> (i32, i32) {
    %c0_i32 = arith.constant 0 : i32
    %c0_i32_0 = arith.constant 0 : i32
    return %c0_i32, %arg1 : i32, i32
  }
  func.func @transform_3(%arg0: i32, %arg1: i32, %arg2: i32) -> (i32, i32) {
    %c0_i32 = arith.constant 0 : i32
    return %arg0, %arg1 : i32, i32
  }
}

</mosaic_0001>

<bundles_post_ra>
// kernel: tpu_custom_call.1
= control target key start
LH: loop header
LB: loop body
LE: loop exit
PB: predicated region body
PF: predicated region fallthrough
CT: control target
= control target key end

     0   :  { %8 = vsyncpa [#allocation3], 0  ;;  %s514_s0 = inlined_call_operand.hbm [shape: bf16[32,128], index: 0, kind: input, shape index: {}]   ;;  %s515_s1 = inlined_call_operand.hbm [shape: bf16[128,256], index: 1, kind: input, shape index: {}]   ;;  %s516_s2 = inlined_call_operand.vmem [shape: f32[1,256], index: 2, kind: input, shape index: {}]   ;;  %s517_s3 = inlined_call_operand.hbm [shape: f32[32,256], index: 3, kind: output, shape index: {}]  }
   0x1   :  { %9 = vsyncpa [#allocation6], 0 }
   0x2   :  { %10 = vsyncpa [#allocation4], 0  ;;  %s445_s12 = smov [#allocation2]   ;;  %s373_s16 = scalar_lea.hbm %s514_s0, 256 }
   0x3   :  { %s16_s13 = sshll.u32 %s445_s12, 4  ;;  %p374_p0 = scmp.ne.s32.totalorder %s514_s0, %s373_s16  ;;  %s17_s13 = int_to_ptr.vmem [resolvable:$true] %s16_s13 }
   0x4   :  { %p377_p1 = scmp.lt.u32.totalorder %s373_s16, %s514_s0 }
   0x6   :  { %p379_p2 = pnand %p377_p1, %p374_p0 }
   0x8   :  { %382 = shalt.err (!%p379_p2)
}
   0x9   :  { %s383_s21 = scalar_lea.vmem %s17_s13, 256  ;;  %p388_p4 = scmp.lt.s32.totalorder %s17_s13, %s17_s13 }
   0xa   :  { %p384_p3 = scmp.ne.s32.totalorder %s17_s13, %s383_s21  ;;  %p389_p5 = scmp.lt.s32.totalorder %s383_s21, %s383_s21 }
   0xc   :  { %p390_p6 = por %p389_p5, %p388_p4 }
   0xe   :  { %p391_p7 = pnand %p390_p6, %p384_p3 }
  0x10   :  { %394 = shalt.err (!%p391_p7)
}
  0x11   :  { %s446_s22 = smov 64   ;;  %s447_s23 = smov 4  }
  0x12   :  { %22 = dma.hbm_to_vmem [thread:$0]  %s514_s0, 256, %s17_s13, [#allocation3], %s446_s22, %s446_s22, %s447_s23  }
  0x13   :  { %s448_s26 = smov [#allocation5]   ;;  %s395_s30 = scalar_lea.hbm %s515_s1, 2048 }
  0x14   :  { %s28_s27 = sshll.u32 %s448_s26, 4  ;;  %p396_p8 = scmp.ne.s32.totalorder %s515_s1, %s395_s30  ;;  %s29_s27 = int_to_ptr.vmem [resolvable:$true] %s28_s27 }
  0x15   :  { %p399_p9 = scmp.lt.u32.totalorder %s395_s30, %s515_s1 }
  0x17   :  { %p401_p10 = pnand %p399_p9, %p396_p8 }
  0x19   :  { %404 = shalt.err (!%p401_p10)
}
  0x1a   :  { %s405_s8 = scalar_lea.vmem %s29_s27, 2048  ;;  %p410_p12 = scmp.lt.s32.totalorder %s29_s27, %s29_s27 }
  0x1b   :  { %p406_p11 = scmp.ne.s32.totalorder %s29_s27, %s405_s8  ;;  %p411_p13 = scmp.lt.s32.totalorder %s405_s8, %s405_s8 }
  0x1d   :  { %p412_p0 = por %p411_p13, %p410_p12 }
  0x1f   :  { %p413_p1 = pnand %p412_p0, %p406_p11 }
  0x21   :  { %416 = shalt.err (!%p413_p1)
}
  0x22   :  { %s449_s0 = smov 128   ;;  %s450_s9 = smov 8  }
  0x23   :  { %34 = dma.hbm_to_vmem [thread:$0]  %s515_s1, 2048, %s29_s27, [#allocation6], %s449_s0, %s449_s0, %s450_s9  }
  0x24   :  { %439 = dma.done.wait [#allocation3], 256  }
  0x25   :  { %440 = vsyncadd [#allocation3], 4294967040 }
  0x26   :  { %441 = dma.done.wait [#allocation6], 2048  }
  0x27   :  { %442 = vsyncadd [#allocation6], 4294965248  ;;  %v451_v0 = vmov 0   ;;  %v347_v1 = vld [vmem:[#allocation5 + $0x4] ss:$8 sps:$4 sm:$0xff]   ;;  %v371_v17 = vld [vmem:[#allocation2] sm:$0xff]   ;;  %v258_v19 = vlaneseq }
  0x28   :  { %208 = vmatprep.mubr.bf16.mxu0 %v451_v0  ;;  %218 = vmatprep.mubr.bf16.mxu1 %v451_v0  ;;  %v349_v2 = vld [vmem:[#allocation5] ss:$8 sps:$4 sm:$0xff]   ;;  %v350_v3 = vld [vmem:[#allocation5 + $0x14] ss:$8 sps:$4 sm:$0xff]   ;;  %v352_v4 = vld [vmem:[#allocation5 + $0x10] ss:$8 sps:$4 sm:$0xff]  }
  0x29   :  { %176 = vmatprep.subr.bf16.mxu0 %v347_v1  ;;  %320 = vmatprep.subr.bf16.mxu1 %v347_v1  ;;  %v353_v5 = vld [vmem:[#allocation5 + $0x24] ss:$8 sps:$4 sm:$0xff]   ;;  %v355_v6 = vld [vmem:[#allocation5 + $0x20] ss:$8 sps:$4 sm:$0xff]   ;;  %v356_v7 = vld [vmem:[#allocation5 + $0x34] ss:$8 sps:$4 sm:$0xff]  }
  0x2a   :  { %177 = vmatpush1.bf16.msra.mxu0 %v349_v2  ;;  %328 = vmatpush1.bf16.msra.mxu1 %v349_v2  ;;  %v358_v8 = vld [vmem:[#allocation5 + $0x30] ss:$8 sps:$4 sm:$0xff]   ;;  %v359_v9 = vld [vmem:[#allocation5 + $0x44] ss:$8 sps:$4 sm:$0xff]   ;;  %v361_v10 = vld [vmem:[#allocation5 + $0x40] ss:$8 sps:$4 sm:$0xff]  }
  0x2b   :  { %178 = vmatprep.subr.bf16.mxu0 %v350_v3  ;;  %321 = vmatprep.subr.bf16.mxu1 %v350_v3  ;;  %v362_v11 = vld [vmem:[#allocation5 + $0x54] ss:$8 sps:$4 sm:$0xff]   ;;  %v364_v12 = vld [vmem:[#allocation5 + $0x50] ss:$8 sps:$4 sm:$0xff]   ;;  %v365_v13 = vld [vmem:[#allocation5 + $0x64] ss:$8 sps:$4 sm:$0xff]  }
  0x2c   :  { %v367_v14 = vld [vmem:[#allocation5 + $0x60] ss:$8 sps:$4 sm:$0xff]   ;;  %v368_v15 = vld [vmem:[#allocation5 + $0x74] ss:$8 sps:$4 sm:$0xff]   ;;  %v370_v16 = vld [vmem:[#allocation5 + $0x70] ss:$8 sps:$4 sm:$0xff]  }
  0x2d   :  { %v372_v18 = vld [vmem:[#allocation2 + $0x8] sm:$0xff]   ;;  %v259_v20 = vshrl.u32 %v258_v19, 7  ;;  %v256_v22 = vld [vmem:[%s516_s2] sm:$0x3]  ;;  %s452_s13 = smov [#allocation7]  }
  0x2e   :  { %179 = vmatpush1.bf16.msra.mxu0 %v352_v4  ;;  %329 = vmatpush1.bf16.msra.mxu1 %v352_v4  ;;  %s289_s14 = sshll.u32 %s452_s13, 4  ;;  %s290_s14 = int_to_ptr.vmem [resolvable:$true] %s289_s14 }
  0x2f   :  { %180 = vmatprep.subr.bf16.mxu0 %v353_v5  ;;  %322 = vmatprep.subr.bf16.mxu1 %v353_v5  ;;  %v260_v21 = vsub.s32 0, %v259_v20  ;;  %v264_v23 = vsub.s32 1, %v259_v20  ;;  %s417_s2 = scalar_lea.vmem %s290_s14, 1024  ;;  %p422_p3 = scmp.lt.s32.totalorder %s290_s14, %s290_s14 }
  0x30   :  { %p418_p2 = scmp.ne.s32.totalorder %s290_s14, %s417_s2  ;;  %p423_p4 = scmp.lt.s32.totalorder %s417_s2, %s417_s2 }
  0x31   :  { %v261_v24 = vrot.slane %v256_v22, %v260_v21  ;;  %v265_v27 = vrot.slane %v256_v22, %v264_v23 }
  0x32   :  { %181 = vmatpush1.bf16.msra.mxu0 %v355_v6  ;;  %330 = vmatpush1.bf16.msra.mxu1 %v355_v6  ;;  %p424_p5 = por %p423_p4, %p422_p3 }
  0x33   :  { %182 = vmatprep.subr.bf16.mxu0 %v356_v7  ;;  %323 = vmatprep.subr.bf16.mxu1 %v356_v7 }
  0x34   :  { %p425_p6 = pnand %p424_p5, %p418_p2 }
  0x36   :  { %183 = vmatpush1.bf16.msra.mxu0 %v358_v8  ;;  %331 = vmatpush1.bf16.msra.mxu1 %v358_v8 }
  0x37   :  { %184 = vmatprep.subr.bf16.mxu0 %v359_v9  ;;  %324 = vmatprep.subr.bf16.mxu1 %v359_v9 }
  0x3a   :  { %185 = vmatpush1.bf16.msra.mxu0 %v361_v10  ;;  %332 = vmatpush1.bf16.msra.mxu1 %v361_v10 }
  0x3b   :  { %186 = vmatprep.subr.bf16.mxu0 %v362_v11  ;;  %325 = vmatprep.subr.bf16.mxu1 %v362_v11 }
  0x3e   :  { %187 = vmatpush1.bf16.msra.mxu0 %v364_v12  ;;  %333 = vmatpush1.bf16.msra.mxu1 %v364_v12 }
  0x3f   :  { %188 = vmatprep.subr.bf16.mxu0 %v365_v13  ;;  %326 = vmatprep.subr.bf16.mxu1 %v365_v13 }
  0x42   :  { %189 = vmatpush1.bf16.msra.mxu0 %v367_v14  ;;  %334 = vmatpush1.bf16.msra.mxu1 %v367_v14 }
  0x43   :  { %190 = vmatprep.subr.bf16.mxu0 %v368_v15  ;;  %327 = vmatprep.subr.bf16.mxu1 %v368_v15 }
  0x46   :  { %191 = vmatpush1.bf16.msra.mxu0 %v370_v16  ;;  %335 = vmatpush1.bf16.msra.mxu1 %v370_v16 }
  0x49   :  { %209 = vmatmul.mubr.bf16.vlgmr.msra.gmra.mrb[0].mxu0 %v371_v17  ;;  %219 = vmatmul.mubr.bf16.vlgmr.msra.gmra.mrb[0].mxu1 %v372_v18 }
 0x11c   :  { %v210_v25 = vpop.f32.mrb[0].mxu0  ;;  %v220_v26 = vpop.f32.mrb[0].mxu1 }
 0x11d   :  { %v212_v28 = vpop.f32.mrb[1].mxu0  ;;  %v222_v29 = vpop.f32.mrb[1].mxu1  ;;  %v268_v32 = vadd.f32 %v261_v24, %v210_v25  ;;  %v272_v33 = vadd.f32 %v261_v24, %v220_v26 }
 0x11e   :  { %v214_v30 = vpop.f32.mrb[2].mxu0  ;;  %v224_v31 = vpop.f32.mrb[2].mxu1  ;;  %v269_v36 = vadd.f32 %v265_v27, %v212_v28  ;;  %v273_v37 = vadd.f32 %v265_v27, %v222_v29 }
 0x11f   :  { %v216_v34 = vpop.f32.mrb[3].mxu0  ;;  %v226_v35 = vpop.f32.mrb[3].mxu1  ;;  %276 = vst [vmem:[#allocation7] sm:$0xff] %v268_v32  ;;  %280 = vst [vmem:[#allocation7 + $0x20] sm:$0xff] %v272_v33  ;;  %v270_v38 = vadd.f32 %v261_v24, %v214_v30  ;;  %v274_v39 = vadd.f32 %v261_v24, %v224_v31 }
 0x120   :  { %277 = vst [vmem:[#allocation7 + $0x8] sm:$0xff] %v269_v36  ;;  %281 = vst [vmem:[#allocation7 + $0x28] sm:$0xff] %v273_v37  ;;  %v271_v40 = vadd.f32 %v265_v27, %v216_v34  ;;  %v275_v41 = vadd.f32 %v265_v27, %v226_v35 }
 0x121   :  { %278 = vst [vmem:[#allocation7 + $0x10] sm:$0xff] %v270_v38  ;;  %282 = vst [vmem:[#allocation7 + $0x30] sm:$0xff] %v274_v39 }
 0x122   :  { %279 = vst [vmem:[#allocation7 + $0x18] sm:$0xff] %v271_v40  ;;  %283 = vst [vmem:[#allocation7 + $0x38] sm:$0xff] %v275_v41 }
 0x123   :  { %428 = shalt.err (!%p425_p6)
}
 0x124   :  { %s429_s17 = scalar_lea.hbm %s517_s3, 1024 }
 0x125   :  { %p430_p7 = scmp.ne.s32.totalorder %s517_s3, %s429_s17  ;;  %p433_p8 = scmp.lt.u32.totalorder %s429_s17, %s517_s3 }
 0x127   :  { %p435_p9 = pnand %p433_p8, %p430_p7 }
 0x129   :  { %438 = shalt.err (!%p435_p9)
}
 0x12a   :  { %s453_s22 = smov 256   ;;  %s454_s23 = smov 16  }
 0x12b   :  { %295 = dma.vmem_to_hbm [thread:$0]  %s290_s14, 1024, %s517_s3, [#allocation4], %s453_s22, %s453_s22, %s454_s23  }
 0x12c   :  { %443 = dma.done.wait [#allocation4], 1024  }
 0x12d   :  { %444 = vsyncadd [#allocation4], 4294966272 }
 0x12e   :  { %299 = vsyncpa [#allocation3], 1 }
 0x12f   :  { %300 = vsyncpa [#allocation6], 1 }
 0x130   :  { %301 = vsyncpa [#allocation4], 1 }

</bundles_post_ra>
